<compile_context>
chip_gen: v5e
topology: v5e:2x2
jax: 0.10.0
libtpu: 0.0.40
codegen_flags: <defaults>
</compile_context>

<pallas_src>
import jax
import jax.numpy as jnp
from jax.experimental import pallas as pl
from jax.experimental.pallas import tpu as pltpu

B, S = 2, 8            # batch, sequence length
D_MODEL = 128          # d_model
TOKEN_SIZE = 256       # token_size (generator vocab), lane-dense multiple of 128

MAX_TILE_N = 512       # lane-dense weight/output tile cap (VMEM-safe on v7x too)


# ------------------------------------------------------------------ kernel

def _generator_kernel(x_ref, w_ref, b_ref, o_ref):
    # (M, D)bf16 @ (D, TILE_N)bf16 -> f32 accumulation on the MXU,
    # bias add + store in f32 on the VPU (lane-dense, unmasked stores).
    o_ref[...] = (
        jnp.dot(x_ref[...], w_ref[...], preferred_element_type=jnp.float32)
        + b_ref[...]
    )


# ----------------------------------------------------------------- wrapper

def _pick_tile_n(token_size: int) -> int:
    """Largest lane-dense (multiple-of-128) tile <= MAX_TILE_N dividing token_size."""
    for t in (512, 384, 256, 128):
        if t <= MAX_TILE_N and token_size % t == 0:
            return t
    return token_size  # small / irregular vocab: single full-width tile


def generator_forward(x, w, b):
    """Linear(d_model, token_size) followed by view(-1, token_size).

    x: (..., d_model) float32
    w: (d_model, token_size)  -- PyTorch (out,in) weight pre-transposed to (in,out)
    b: (token_size,) or (1, token_size) float32
    returns: (prod(leading dims), token_size) float32
    """
    lead = 1
    for dim in x.shape[:-1]:
        lead *= dim
    d_model = x.shape[-1]
    token_size = w.shape[-1]

    # `.view(-1, V)` of the reference; cast inputs to bf16 (MXU-native), keep
    # bias and output in f32.
    x2 = x.reshape(lead, d_model).astype(jnp.bfloat16)
    w2 = w.astype(jnp.bfloat16)
    b2 = b.reshape(1, token_size).astype(jnp.float32)

    tile_n = _pick_tile_n(token_size)
    grid = (token_size // tile_n,)

    return pl.pallas_call(
        _generator_kernel,
        out_shape=jax.ShapeDtypeStruct((lead, token_size), jnp.float32),
        grid_spec=pltpu.PrefetchScalarGridSpec(
            num_scalar_prefetch=0,
            grid=grid,
            in_specs=[
                # x: full (M, D) block, resident across all vocab tiles.
                pl.BlockSpec((lead, d_model), lambda j: (0, 0)),
                # w: stream lane-dense (D, TILE_N) tiles along the vocab axis.
                pl.BlockSpec((d_model, tile_n), lambda j: (0, j)),
                # b: matching (1, TILE_N) bias tile.
                pl.BlockSpec((1, tile_n), lambda j: (0, j)),
            ],
            out_specs=pl.BlockSpec((lead, tile_n), lambda j: (0, j)),
        ),
        compiler_params=pltpu.CompilerParams(
            # Vocab tiles are independent -> megacore-shardable on v7x.
            dimension_semantics=("parallel",),
        ),
    )(x2, w2, b2)


# -------------------------------------------------------------------- main

if __name__ == "__main__":
    key = jax.random.PRNGKey(0)
    kx, kw, kb = jax.random.split(key, 3)

    x = jax.random.normal(kx, (B, S, D_MODEL), dtype=jnp.float32)
    # PyTorch nn.Linear stores weight as (out_features, in_features) and computes
    # x @ W.T + b; we initialize the equivalent (in, out) matrix directly.
    w = 0.05 * jax.random.normal(kw, (D_MODEL, TOKEN_SIZE), dtype=jnp.float32)
    b = 0.01 * jax.random.normal(kb, (1, TOKEN_SIZE), dtype=jnp.float32)

    out = generator_forward(x, w, b)
    jax.block_until_ready(out)

    # forward() returns logits flattened to (-1, token_size)
    assert out.shape == (B * S, TOKEN_SIZE)

    # Tight parity against a bf16-input / f32-accumulate reference (what the
    # MXU actually computes).
    x2 = x.reshape(B * S, D_MODEL)
    ref_bf16 = (
        jnp.dot(x2.astype(jnp.bfloat16), w.astype(jnp.bfloat16),
                preferred_element_type=jnp.float32)
        + b
    )
    assert bool(jnp.allclose(out, ref_bf16, atol=1e-3, rtol=1e-3))

    # Looser semantic check against the pure-f32 PyTorch-equivalent Linear.
    ref_f32 = x2 @ w + b
    assert bool(jnp.allclose(out, ref_f32, atol=3e-2, rtol=3e-2))

    print("KERNEL_OK")
</pallas_src>

<mosaic_0001>
module attributes {stable_mosaic.version = 11 : i64} {
  func.func @_generator_kernel(%arg0: i32, %arg1: memref<16x128xbf16, #tpu.memory_space<vmem>>, %arg2: memref<128x256xbf16, #tpu.memory_space<vmem>>, %arg3: memref<1x256xf32, #tpu.memory_space<vmem>>, %arg4: memref<16x256xf32, #tpu.memory_space<vmem>>) attributes {dimension_semantics = [#tpu.dimension_semantics<parallel>], iteration_bounds = array<i64: 1>, scalar_prefetch = 0 : i64, scratch_operands = 0 : i64, tpu.core_type = #tpu.core_type<tc>, window_params = [{pipeline_mode = #tpu.pipeline_mode<synchronous>, transform_indices = @transform_0, window_bounds = array<i64: 16, 128>}, {transform_indices = @transform_1, window_bounds = array<i64: 128, 256>}, {transform_indices = @transform_2, window_bounds = array<i64: 1, 256>}, {transform_indices = @transform_3, window_bounds = array<i64: 16, 256>}]} {
    %c0 = arith.constant 0 : index
    %c0_0 = arith.constant 0 : index
    %0 = vector.load %arg1[%c0, %c0_0] : memref<16x128xbf16, #tpu.memory_space<vmem>>, vector<16x128xbf16>
    %c0_1 = arith.constant 0 : index
    %c0_2 = arith.constant 0 : index
    %1 = vector.load %arg2[%c0_1, %c0_2] : memref<128x256xbf16, #tpu.memory_space<vmem>>, vector<128x256xbf16>
    %cst = arith.constant dense<0.000000e+00> : vector<16x256xf32>
    %2 = tpu.matmul %0, %1, %cst {dimension_numbers = #tpu.dot_dimension_numbers<[1], [0], [0], [1], [0, 0, 1, 1], [], []>} : vector<16x128xbf16>, vector<128x256xbf16>, vector<16x256xf32> -> vector<16x256xf32>
    %c0_3 = arith.constant 0 : index
    %c0_4 = arith.constant 0 : index
    %3 = vector.load %arg3[%c0_3, %c0_4] : memref<1x256xf32, #tpu.memory_space<vmem>>, vector<1x256xf32>
    %4 = vector.broadcast %3 : vector<1x256xf32> to vector<16x256xf32>
    %5 = arith.addf %2, %4 : vector<16x256xf32>
    %c0_5 = arith.constant 0 : index
    %c0_6 = arith.constant 0 : index
    %6 = vector.load %arg4[%c0_5, %c0_6] : memref<16x256xf32, #tpu.memory_space<vmem>>, vector<16x256xf32>
    tpu.vector_store %arg4[%c0_5, %c0_6], %5 {strides = array<i32>} : memref<16x256xf32, #tpu.memory_space<vmem>>, vector<16x256xf32>,
    return
  }
  func.func @transform_0(%arg0: i32) -> (i32, i32) {
    %c0_i32 = arith.constant 0 : i32
    %c0_i32_0 = arith.constant 0 : i32
    %c0_i32_1 = arith.constant 0 : i32
    return %c0_i32, %c0_i32_0 : i32, i32
  }
  func.func @transform_1(%arg0: i32) -> (i32, i32) {
    %c0_i32 = arith.constant 0 : i32
    %c0_i32_0 = arith.constant 0 : i32
    return %c0_i32, %arg0 : i32, i32
  }
  func.func @transform_2(%arg0: i32) -> (i32, i32) {
    %c0_i32 = arith.constant 0 : i32
    %c0_i32_0 = arith.constant 0 : i32
    return %c0_i32, %arg0 : i32, i32
  }
  func.func @transform_3(%arg0: i32) -> (i32, i32) {
    %c0_i32 = arith.constant 0 : i32
    %c0_i32_0 = arith.constant 0 : i32
    return %c0_i32, %arg0 : i32, i32
  }
}

</mosaic_0001>

<bundles_post_ra>
// kernel: tpu_custom_call.1
= control target key start
LH: loop header
LB: loop body
LE: loop exit
PB: predicated region body
PF: predicated region fallthrough
CT: control target
= control target key end

     0   :  { %8 = vsyncpa [#allocation3], 0  ;;  %s461_s0 = inlined_call_operand.hbm [shape: bf16[16,128], index: 0, kind: input, shape index: {}]   ;;  %s462_s1 = inlined_call_operand.hbm [shape: bf16[128,256], index: 1, kind: input, shape index: {}]   ;;  %s463_s2 = inlined_call_operand.hbm [shape: f32[1,256], index: 2, kind: input, shape index: {}]   ;;  %s464_s3 = inlined_call_operand.hbm [shape: f32[16,256], index: 3, kind: output, shape index: {}]  }
   0x1   :  { %9 = vsyncpa [#allocation6], 0  ;;  %s28_s14 = sshll.u32 %s462_s1, 4  ;;  %s29_s14 = int_to_ptr.hbm [resolvable:$true] %s28_s14 }
   0x2   :  { %10 = vsyncpa [#allocation4], 0  ;;  %s419_s15 = smov [#allocation5]   ;;  %s15_s19 = sshll.u32 %s461_s0, 4  ;;  %s16_s19 = int_to_ptr.hbm [resolvable:$true] %s15_s19 }
   0x3   :  { %s30_s16 = sshll.u32 %s419_s15, 4  ;;  %s420_s20 = smov 128   ;;  %s31_s16 = int_to_ptr.vmem [resolvable:$true] %s30_s16 }
   0x4   :  { %s421_s21 = smov 8   ;;  %s422_s22 = smov [#allocation2]  }
   0x5   :  { %36 = dma.hbm_to_vmem [thread:$0]  %s29_s14, 2048, %s31_s16, [#allocation6], %s420_s20, %s420_s20, %s421_s21  }
   0x6   :  { %s17_s23 = sshll.u32 %s422_s22, 4  ;;  %s423_s24 = smov 64   ;;  %s18_s23 = int_to_ptr.vmem [resolvable:$true] %s17_s23 }
   0x7   :  { %s424_s25 = smov 4   ;;  %s42_s27 = sshll.u32 %s463_s2, 4  ;;  %s43_s27 = int_to_ptr.hbm [resolvable:$true] %s42_s27 }
   0x8   :  { %23 = dma.hbm_to_vmem [thread:$0]  %s16_s19, 128, %s18_s23, [#allocation3], %s423_s24, %s423_s24, %s424_s25  }
   0x9   :  { %s425_s28 = smov [#allocation7]  }
   0xa   :  { %s44_s29 = sshll.u32 %s425_s28, 4  ;;  %s45_s29 = int_to_ptr.vmem [resolvable:$true] %s44_s29 }
   0xb   :  { %47 = dma.hbm_to_vmem [thread:$0]  %s43_s27, 32, %s45_s29, [#allocation6]  }
   0xc   :  { %413 = dma.done.wait [#allocation3], 128  }
   0xd   :  { %414 = vsyncadd [#allocation3], 4294967168 }
   0xe   :  { %415 = dma.done.wait [#allocation6], 2080  }
   0xf   :  { %416 = vsyncadd [#allocation6], 4294965216  ;;  %v284_v0 = vld [vmem:[#allocation5 + $0x70] sm:$0xf]  ;;  %v306_v1 = vld [vmem:[#allocation5 + $0x74] sm:$0xf0] }
  0x10   :  { %v305_v2 = vld [vmem:[#allocation5 + $0x74] sm:$0xf]  ;;  %v285_v3 = vor.u32 %v306_v1, %v284_v0  ;;  %v286_v4 = vld [vmem:[#allocation5 + $0x78] sm:$0xf0]  ;;  %v276_v5 = vld [vmem:[#allocation5 + $0x60] sm:$0xf] }
  0x11   :  { %v304_v6 = vld [vmem:[#allocation5 + $0x64] sm:$0xf0]  ;;  %v289_v7 = vor.u32 %v305_v2, %v286_v4  ;;  %v303_v8 = vld [vmem:[#allocation5 + $0x64] sm:$0xf]  ;;  %v278_v9 = vld [vmem:[#allocation5 + $0x68] sm:$0xf0] }
  0x12   :  { %170 = vmatpush.bf16.msra.mxu0 %v285_v3  ;;  %v277_v10 = vor.u32 %v304_v6, %v276_v5  ;;  %v281_v11 = vor.u32 %v303_v8, %v278_v9  ;;  %v268_v12 = vld [vmem:[#allocation5 + $0x50] sm:$0xf]  ;;  %v302_v13 = vld [vmem:[#allocation5 + $0x54] sm:$0xf0]  ;;  %v301_v14 = vld [vmem:[#allocation5 + $0x54] sm:$0xf] }
  0x13   :  { %184 = vmatpush.bf16.msra.mxu1 %v289_v7  ;;  %v270_v15 = vld [vmem:[#allocation5 + $0x58] sm:$0xf0]  ;;  %v269_v16 = vor.u32 %v302_v13, %v268_v12  ;;  %v260_v18 = vld [vmem:[#allocation5 + $0x40] sm:$0xf]  ;;  %v300_v19 = vld [vmem:[#allocation5 + $0x44] sm:$0xf0] }
  0x14   :  { %v273_v17 = vor.u32 %v301_v14, %v270_v15  ;;  %v299_v20 = vld [vmem:[#allocation5 + $0x44] sm:$0xf]  ;;  %v262_v21 = vld [vmem:[#allocation5 + $0x48] sm:$0xf0]  ;;  %v261_v22 = vor.u32 %v300_v19, %v260_v18  ;;  %v252_v24 = vld [vmem:[#allocation5 + $0x30] sm:$0xf] }
  0x15   :  { %v265_v23 = vor.u32 %v299_v20, %v262_v21  ;;  %v298_v25 = vld [vmem:[#allocation5 + $0x34] sm:$0xf0]  ;;  %v297_v26 = vld [vmem:[#allocation5 + $0x34] sm:$0xf]  ;;  %v254_v27 = vld [vmem:[#allocation5 + $0x38] sm:$0xf0] }
  0x16   :  { %171 = vmatpush.bf16.msra.mxu0 %v277_v10  ;;  %v253_v28 = vor.u32 %v298_v25, %v252_v24  ;;  %v257_v29 = vor.u32 %v297_v26, %v254_v27  ;;  %v244_v30 = vld [vmem:[#allocation5 + $0x20] sm:$0xf]  ;;  %v296_v31 = vld [vmem:[#allocation5 + $0x24] sm:$0xf0]  ;;  %v295_v32 = vld [vmem:[#allocation5 + $0x24] sm:$0xf] }
  0x17   :  { %185 = vmatpush.bf16.msra.mxu1 %v281_v11  ;;  %v246_v33 = vld [vmem:[#allocation5 + $0x28] sm:$0xf0]  ;;  %v245_v34 = vor.u32 %v296_v31, %v244_v30  ;;  %v236_v36 = vld [vmem:[#allocation5 + $0x10] sm:$0xf]  ;;  %v294_v37 = vld [vmem:[#allocation5 + $0x14] sm:$0xf0] }
  0x18   :  { %v249_v35 = vor.u32 %v295_v32, %v246_v33  ;;  %v293_v38 = vld [vmem:[#allocation5 + $0x14] sm:$0xf]  ;;  %v238_v39 = vld [vmem:[#allocation5 + $0x18] sm:$0xf0]  ;;  %v237_v40 = vor.u32 %v294_v37, %v236_v36  ;;  %v228_v42 = vld [vmem:[#allocation5] sm:$0xf] }
  0x19   :  { %v241_v41 = vor.u32 %v293_v38, %v238_v39  ;;  %v292_v43 = vld [vmem:[#allocation5 + $0x4] sm:$0xf0]  ;;  %v291_v44 = vld [vmem:[#allocation5 + $0x4] sm:$0xf]  ;;  %v230_v45 = vld [vmem:[#allocation5 + $0x8] sm:$0xf0] }
  0x1a   :  { %172 = vmatpush.bf16.msra.mxu0 %v269_v16  ;;  %v229_v46 = vor.u32 %v292_v43, %v228_v42  ;;  %v233_v47 = vor.u32 %v291_v44, %v230_v45  ;;  %v290_v48 = vld [vmem:[#allocation2] sm:$0xff]  ;;  %v78_v49 = vld [vmem:[#allocation7] sm:$0x3]  ;;  %s426_s0 = smov [#allocation8]   ;;  %s208_s5 = sshll.u32 %s464_s3, 4  ;;  %s209_s5 = int_to_ptr.hbm [resolvable:$true] %s208_s5 }
  0x1b   :  { %186 = vmatpush.bf16.msra.mxu1 %v273_v17  ;;  %v80_v50 = vperm.slane %v78_v49, 0  ;;  %v81_v51 = vperm.slane %v78_v49, 1  ;;  %s206_s2 = sshll.u32 %s426_s0, 4  ;;  %s427_s6 = smov 256   ;;  %s207_s2 = int_to_ptr.vmem [resolvable:$true] %s206_s2 }
  0x1c   :  { %s428_s7 = smov 16  }
  0x1e   :  { %173 = vmatpush.bf16.msra.mxu0 %v261_v22 }
  0x1f   :  { %187 = vmatpush.bf16.msra.mxu1 %v265_v23 }
  0x22   :  { %174 = vmatpush.bf16.msra.mxu0 %v253_v28 }
  0x23   :  { %188 = vmatpush.bf16.msra.mxu1 %v257_v29 }
  0x26   :  { %175 = vmatpush.bf16.msra.mxu0 %v245_v34 }
  0x27   :  { %189 = vmatpush.bf16.msra.mxu1 %v249_v35 }
  0x2a   :  { %176 = vmatpush.bf16.msra.mxu0 %v237_v40 }
  0x2b   :  { %190 = vmatpush.bf16.msra.mxu1 %v241_v41 }
  0x2e   :  { %177 = vmatpush.bf16.msra.mxu0 %v229_v46 }
  0x2f   :  { %191 = vmatpush.bf16.msra.mxu1 %v233_v47 }
  0x31   :  { %178 = vmatmul.bf16.vlgmr.msra.gmra.mxu0 %v290_v48 }
  0x32   :  { %192 = vmatmul.bf16.vlgmr.msra.gmra.mxu1 %v290_v48 }
  0xae   :  { %v179_v52 = vpop.f32.mrf.mxu0 }
  0xaf   :  { %v180_v53 = vadd.f32 %v179_v52, %v80_v50  ;;  %v193_v54 = vpop.f32.mrf.mxu1 }
  0xb0   :  { %v194_v55 = vadd.f32 %v193_v54, %v81_v51 }
  0xb1   :  { %198 = vst [vmem:[#allocation8] sm:$0xff] %v180_v53 }
  0xb2   :  { %199 = vst [vmem:[#allocation8 + $0x8] sm:$0xff] %v194_v55 }
  0xb6   :  { %v181_v56 = vpop.f32.mrf.mxu0 }
  0xb7   :  { %v182_v57 = vadd.f32 %v181_v56, %v80_v50  ;;  %v195_v58 = vpop.f32.mrf.mxu1 }
  0xb8   :  { %v196_v59 = vadd.f32 %v195_v58, %v81_v51 }
  0xb9   :  { %200 = vst [vmem:[#allocation8 + $0x10] sm:$0xff] %v182_v57 }
  0xba   :  { %201 = vst [vmem:[#allocation8 + $0x18] sm:$0xff] %v196_v59 }
  0xbb   :  { %214 = dma.vmem_to_hbm [thread:$0]  %s207_s2, 512, %s209_s5, [#allocation4], %s427_s6, %s427_s6, %s428_s7  }
  0xbc   :  { %417 = dma.done.wait [#allocation4], 512  }
  0xbd   :  { %418 = vsyncadd [#allocation4], 4294966784 }
  0xbe   :  { %219 = vsyncpa [#allocation3], 1 }
  0xbf   :  { %220 = vsyncpa [#allocation6], 1 }
  0xc0   :  { %221 = vsyncpa [#allocation4], 1 }

</bundles_post_ra>
